<compile_context>
chip_gen: v5e
topology: v5e:2x2
jax: 0.10.0
libtpu: 0.0.40
codegen_flags: <defaults>
</compile_context>

<pallas_src>
import jax
import jax.numpy as jnp
from jax.experimental import pallas as pl
from jax.experimental.pallas import tpu as pltpu


def _add_kernel(a_ref, b_ref, o_ref):
    # Elementwise sum of two Dirichlet-alpha tiles (VPU, lane-dense).
    o_ref[...] = a_ref[...] + b_ref[...]


def _choose_tile(total_elems, *, max_rows=512, max_cols=1024):
    """Pick a lane-dense (rows, cols) block: rows % 8 == 0, cols % 128 == 0.

    Shrinks the block for small inputs so zero-padding stays bounded; large
    inputs get the full (512, 1024) block (2 MiB for f32).
    """
    rows, cols = max_rows, max_cols
    while rows > 8 and rows * cols // 2 >= total_elems:
        rows //= 2
    while cols > 128 and rows * cols // 2 >= total_elems:
        cols //= 2
    return rows, cols


def _pallas_add_flat(a_flat, b_flat):
    """Elementwise add of two equal-length 1-D arrays via a lane-dense tiled kernel."""
    assert a_flat.ndim == 1 and a_flat.shape == b_flat.shape
    total = a_flat.shape[0]
    dtype = a_flat.dtype
    itemsize = jnp.dtype(dtype).itemsize

    rows, cols = _choose_tile(total)
    n_rows = pl.cdiv(total, cols)
    n_rows = pl.cdiv(n_rows, rows) * rows          # whole number of row-blocks
    padded = n_rows * cols
    if padded != total:
        a_flat = jnp.pad(a_flat, (0, padded - total))
        b_flat = jnp.pad(b_flat, (0, padded - total))
    a2d = a_flat.reshape(n_rows, cols)
    b2d = b_flat.reshape(n_rows, cols)

    grid = (n_rows // rows,)
    spec = pl.BlockSpec((rows, cols), lambda i: (i, 0))

    out2d = pl.pallas_call(
        _add_kernel,
        out_shape=jax.ShapeDtypeStruct((n_rows, cols), dtype),
        grid_spec=pltpu.PrefetchScalarGridSpec(
            num_scalar_prefetch=0,
            grid=grid,
            in_specs=[spec, spec],
            out_specs=spec,
        ),
        compiler_params=pltpu.CompilerParams(
            dimension_semantics=("parallel",),
            vmem_limit_bytes=32 * 1024 * 1024,
        ),
        cost_estimate=pl.CostEstimate(
            flops=padded,
            transcendentals=0,
            bytes_accessed=3 * padded * itemsize,
        ),
    )(a2d, b2d)

    out_flat = out2d.reshape(-1)
    if padded != total:
        out_flat = out_flat[:total]
    return out_flat


class SumUncertainty:
    """JAX/Pallas port of the PyTorch SumUncertainty module.

    Output has shape [batch*height*width, n_classes] (or the 2-D input shape).
    """

    def __init__(self, n_classes):
        self.n_classes = n_classes

    def __call__(self, alpha1, alpha2):
        assert alpha1.ndim == 4 or alpha1.ndim == 2
        assert alpha2.ndim == 4 or alpha2.ndim == 2
        assert alpha1.shape == alpha2.shape
        assert alpha1.shape[1] == self.n_classes
        assert alpha2.shape[1] == self.n_classes

        dtype = jnp.result_type(alpha1.dtype, alpha2.dtype)
        alpha1 = alpha1.astype(dtype)
        alpha2 = alpha2.astype(dtype)

        if alpha1.ndim == 4:
            # Faithful to the reference (incl. its `alhpa2` typo): alpha1 is
            # permuted NCHW->NHWC then flattened; alpha2 is flattened directly
            # from NCHW memory order.
            # TODO(synk): fuse this transpose into the kernel (read alpha1 as
            # (1, C, hw_tile) NCHW blocks and transpose on the XLU) to drop one
            # full HBM read+write of alpha1 if this module becomes hot.
            alpha1 = jnp.transpose(alpha1, (0, 2, 3, 1))
            out_shape = (alpha1.shape[0] * alpha1.shape[1] * alpha1.shape[2],
                         self.n_classes)
        else:
            out_shape = alpha1.shape

        out_flat = _pallas_add_flat(alpha1.reshape(-1), alpha2.reshape(-1))
        return out_flat.reshape(out_shape)


if __name__ == "__main__":
    n_classes = 4
    B, H, W = 2, 16, 16  # small deterministic example shapes (NCHW inputs)

    key = jax.random.PRNGKey(0)
    k1, k2 = jax.random.split(key)
    # Dirichlet alphas are positive; exp of normals keeps it deterministic.
    alpha1 = jnp.exp(jax.random.normal(k1, (B, n_classes, H, W), jnp.float32))
    alpha2 = jnp.exp(jax.random.normal(k2, (B, n_classes, H, W), jnp.float32))

    module = SumUncertainty(n_classes)
    out = jax.block_until_ready(module(alpha1, alpha2))

    # Reference check (plain JAX, same typo-faithful semantics).
    ref = (
        jnp.transpose(alpha1, (0, 2, 3, 1)).reshape(-1, n_classes)
        + alpha2.reshape(-1, n_classes)
    )
    assert out.shape == (B * H * W, n_classes)
    assert jnp.allclose(out, ref, atol=1e-6, rtol=1e-6)

    # Also exercise the 2-D input path once.
    a2 = jnp.exp(jax.random.normal(k1, (B * H * W, n_classes), jnp.float32))
    b2 = jnp.exp(jax.random.normal(k2, (B * H * W, n_classes), jnp.float32))
    out2 = jax.block_until_ready(module(a2, b2))
    assert out2.shape == a2.shape
    assert jnp.allclose(out2, a2 + b2, atol=1e-6, rtol=1e-6)

    print("KERNEL_OK")
</pallas_src>

<mosaic_0001>
module attributes {stable_mosaic.version = 11 : i64} {
  func.func @_add_kernel(%arg0: i32, %arg1: memref<8x256xf32, #tpu.memory_space<vmem>>, %arg2: memref<8x256xf32, #tpu.memory_space<vmem>>, %arg3: memref<8x256xf32, #tpu.memory_space<vmem>>) attributes {dimension_semantics = [#tpu.dimension_semantics<parallel>], iteration_bounds = array<i64: 1>, scalar_prefetch = 0 : i64, scratch_operands = 0 : i64, tpu.core_type = #tpu.core_type<tc>, window_params = [{transform_indices = @transform_0, window_bounds = array<i64: 8, 256>}, {transform_indices = @transform_1, window_bounds = array<i64: 8, 256>}, {transform_indices = @transform_2, window_bounds = array<i64: 8, 256>}]} {
    %c0 = arith.constant 0 : index
    %c0_0 = arith.constant 0 : index
    %0 = vector.load %arg1[%c0, %c0_0] : memref<8x256xf32, #tpu.memory_space<vmem>>, vector<8x256xf32>
    %c0_1 = arith.constant 0 : index
    %c0_2 = arith.constant 0 : index
    %1 = vector.load %arg2[%c0_1, %c0_2] : memref<8x256xf32, #tpu.memory_space<vmem>>, vector<8x256xf32>
    %2 = arith.addf %0, %1 : vector<8x256xf32>
    %c0_3 = arith.constant 0 : index
    %c0_4 = arith.constant 0 : index
    %3 = vector.load %arg3[%c0_3, %c0_4] : memref<8x256xf32, #tpu.memory_space<vmem>>, vector<8x256xf32>
    tpu.vector_store %arg3[%c0_3, %c0_4], %2 {strides = array<i32>} : memref<8x256xf32, #tpu.memory_space<vmem>>, vector<8x256xf32>,
    return
  }
  func.func @transform_0(%arg0: i32) -> (i32, i32) {
    %c0_i32 = arith.constant 0 : i32
    %c0_i32_0 = arith.constant 0 : i32
    return %arg0, %c0_i32 : i32, i32
  }
  func.func @transform_1(%arg0: i32) -> (i32, i32) {
    %c0_i32 = arith.constant 0 : i32
    %c0_i32_0 = arith.constant 0 : i32
    return %arg0, %c0_i32 : i32, i32
  }
  func.func @transform_2(%arg0: i32) -> (i32, i32) {
    %c0_i32 = arith.constant 0 : i32
    %c0_i32_0 = arith.constant 0 : i32
    return %arg0, %c0_i32 : i32, i32
  }
}

</mosaic_0001>

<bundles_post_ra>
// kernel: tpu_custom_call.1
= control target key start
LH: loop header
LB: loop body
LE: loop exit
PB: predicated region body
PF: predicated region fallthrough
CT: control target
= control target key end

     0   :  { %7 = vsyncpa [#allocation3], 0  ;;  %s174_s0 = inlined_call_operand.hbm [shape: f32[8,256], index: 0, kind: input, shape index: {}]   ;;  %s175_s1 = inlined_call_operand.hbm [shape: f32[8,256], index: 1, kind: input, shape index: {}]   ;;  %s176_s2 = inlined_call_operand.hbm [shape: f32[8,256], index: 2, kind: output, shape index: {}]  }
   0x1   :  { %8 = vsyncpa [#allocation6], 0 }
   0x2   :  { %9 = vsyncpa [#allocation4], 0  ;;  %s15_s11 = sshll.u32 %s174_s0, 4  ;;  %s147_s12 = smov [#allocation2]   ;;  %s16_s11 = int_to_ptr.hbm [resolvable:$true] %s15_s11 }
   0x3   :  { %s17_s13 = sshll.u32 %s147_s12, 4  ;;  %s26_s16 = sshll.u32 %s175_s1, 4  ;;  %s18_s13 = int_to_ptr.vmem [resolvable:$true] %s17_s13  ;;  %s27_s16 = int_to_ptr.hbm [resolvable:$true] %s26_s16 }
   0x4   :  { %20 = dma.hbm_to_vmem [thread:$0]  %s16_s11, 256, %s18_s13, [#allocation3]  }
   0x5   :  { %s148_s17 = smov [#allocation5]  }
   0x6   :  { %s28_s18 = sshll.u32 %s148_s17, 4  ;;  %s29_s18 = int_to_ptr.vmem [resolvable:$true] %s28_s18 }
   0x7   :  { %31 = dma.hbm_to_vmem [thread:$0]  %s27_s16, 256, %s29_s18, [#allocation6]  }
   0x8   :  { %141 = dma.done.wait [#allocation3], 256  }
   0x9   :  { %142 = vsyncadd [#allocation3], 4294967040 }
   0xa   :  { %143 = dma.done.wait [#allocation6], 256  }
   0xb   :  { %144 = vsyncadd [#allocation6], 4294967040  ;;  %s149_s19 = smov [#allocation7]   ;;  %s55_s22 = sshll.u32 %s176_s2, 4  ;;  %v40_v0 = vld [vmem:[#allocation2] sm:$0xff]  ;;  %v42_v1 = vld [vmem:[#allocation5] sm:$0xff]  ;;  %s56_s22 = int_to_ptr.hbm [resolvable:$true] %s55_s22 }
   0xc   :  { %s53_s0 = sshll.u32 %s149_s19, 4  ;;  %v41_v2 = vld [vmem:[#allocation2 + $0x8] sm:$0xff]  ;;  %v44_v3 = vadd.f32 %v42_v1, %v40_v0  ;;  %v43_v4 = vld [vmem:[#allocation5 + $0x8] sm:$0xff]  ;;  %s54_s0 = int_to_ptr.vmem [resolvable:$true] %s53_s0 }
   0xd   :  { %v45_v5 = vadd.f32 %v43_v4, %v41_v2 }
   0xe   :  { %46 = vst [vmem:[#allocation7] sm:$0xff] %v44_v3 }
   0xf   :  { %47 = vst [vmem:[#allocation7 + $0x8] sm:$0xff] %v45_v5 }
  0x10   :  { %58 = dma.vmem_to_hbm [thread:$0]  %s54_s0, 256, %s56_s22, [#allocation4]  }
  0x11   :  { %145 = dma.done.wait [#allocation4], 256  }
  0x12   :  { %146 = vsyncadd [#allocation4], 4294967040 }
  0x13   :  { %63 = vsyncpa [#allocation3], 1 }
  0x14   :  { %64 = vsyncpa [#allocation6], 1 }
  0x15   :  { %65 = vsyncpa [#allocation4], 1 }

</bundles_post_ra>
